<compile_context>
chip_gen: v5e
topology: v5e:2x2
jax: 0.10.0
libtpu: 0.0.40
codegen_flags: <defaults>
</compile_context>

<pallas_src>
import jax
import jax.numpy as jnp
from jax.experimental import pallas as pl
from jax.experimental.pallas import tpu as pltpu

TARGET_BLOCK_BYTES = 2 * 1024 * 1024      # ~2 MiB per block buffer
LANE_TILE_CANDIDATES = (1024, 512, 256, 128)


def _round_up(n: int, m: int) -> int:
    return ((n + m - 1) // m) * m


def _make_exp_kernel(binary: bool):
    def exp_kernel(kappa_ref, x_ref, o_ref):
        # kappa_ref: SMEM f32[1]; x_ref/o_ref: VMEM (row_tile, lane_tile)
        k = kappa_ref[0]
        x = x_ref[...]                                # native dtype
        y = jnp.exp(k * x.astype(jnp.float32))        # exp in f32 (v5e: no bf16 EUP)
        if binary:
            # Match torch exactly: exp(k*x) * (x > 0.55).float()
            #  - mask is computed on the native-dtype input
            #  - multiply (not where), so inf * 0 -> nan just like torch
            y = y * (x > 0.55).astype(jnp.float32)
        o_ref[...] = y.astype(o_ref.dtype)

    return exp_kernel


def _exp_layer_jnp(x: jax.Array, vmf_kappa, binary: bool = False) -> jax.Array:
    """Plain-JAX fallback / reference with identical semantics."""
    k = jnp.asarray(vmf_kappa, jnp.float32)
    y = jnp.exp(k * x.astype(jnp.float32))
    if binary:
        y = y * (x > 0.55).astype(jnp.float32)
    return y.astype(x.dtype)


def exp_layer_pallas(
    x: jax.Array,
    vmf_kappa,
    binary: bool = False,
    *,
    donate_x: bool = False,
    min_pallas_elements: int = 1 << 16,
) -> jax.Array:
    """ExpLayer forward: exp(vMF_kappa * x), optionally * (x > 0.55)."""
    orig_shape = x.shape
    total = x.size
    if total == 0:
        return x

    # Tiny tensors: launch/step overhead dominates -> plain jnp.
    if total < min_pallas_elements:
        return _exp_layer_jnp(x, vmf_kappa, binary)

    # Largest multiple-of-128 lane width that divides total -> reshape is a
    # free bitcast (no pad, no final slice). Conv activations (C*H*W) almost
    # always have such a factor; if not, jnp is cheaper than padding.
    lane_tile = None
    for cand in LANE_TILE_CANDIDATES:
        if total % cand == 0:
            lane_tile = cand
            break
    if lane_tile is None:
        return _exp_layer_jnp(x, vmf_kappa, binary)

    rows = total // lane_tile
    itemsize = jnp.dtype(x.dtype).itemsize

    # Row tile targeting ~2 MiB per block buffer (multiple of 8 sublanes).
    max_row_tile = max(8, (TARGET_BLOCK_BYTES // (lane_tile * itemsize)) // 8 * 8)
    if rows <= 8:
        # Single block spanning the full row extent (block == array dim is
        # always a legal block shape, even when rows % 8 != 0).
        row_tile = rows
    elif rows <= 2 * max_row_tile:
        # Enough data for 2 blocks: split so a v7x megacore gets work on both
        # TensorCores.
        row_tile = min(max_row_tile, _round_up(pl.cdiv(rows, 2), 8))
    else:
        row_tile = max_row_tile
    grid = (pl.cdiv(rows, row_tile),)   # ragged last block is padded/masked by Pallas

    x2 = x.reshape(rows, lane_tile)     # bitcast, no HBM traffic
    kappa_arr = jnp.asarray(vmf_kappa, dtype=jnp.float32).reshape(1)

    call_kwargs = {}
    if donate_x:
        # Output reuses x's HBM buffer (shapes/dtypes match).
        call_kwargs["input_output_aliases"] = {1: 0}

    out = pl.pallas_call(
        _make_exp_kernel(binary),
        out_shape=jax.ShapeDtypeStruct((rows, lane_tile), x.dtype),
        grid_spec=pltpu.PrefetchScalarGridSpec(
            num_scalar_prefetch=0,
            grid=grid,
            in_specs=[
                # learnable scalar vMF_kappa -> SMEM, untiled
                pl.BlockSpec(memory_space=pltpu.MemorySpace.SMEM),
                pl.BlockSpec((row_tile, lane_tile), lambda i: (i, 0)),
            ],
            out_specs=pl.BlockSpec((row_tile, lane_tile), lambda i: (i, 0)),
        ),
        compiler_params=pltpu.CompilerParams(
            dimension_semantics=("parallel",),
        ),
        **call_kwargs,
    )(kappa_arr, x2)

    return out.reshape(orig_shape)      # bitcast, no HBM traffic


if __name__ == "__main__":
    key = jax.random.PRNGKey(0)
    k1, k2 = jax.random.split(key)
    vmf_kappa = 2.5  # deterministic value for the module's vMF_kappa parameter

    # --- small shape from the module spec; force the Pallas path -------------
    B, C, H, W = 2, 4, 16, 16
    x = jax.random.normal(k1, (B, C, H, W), dtype=jnp.float32)

    y = exp_layer_pallas(x, vmf_kappa, binary=False, min_pallas_elements=0)
    jax.block_until_ready(y)
    y_ref = _exp_layer_jnp(x, vmf_kappa, binary=False)
    assert y.shape == (B, C, H, W)
    assert jnp.allclose(y, y_ref, atol=1e-5, rtol=1e-5), "mismatch (binary=False)"

    yb = exp_layer_pallas(x, vmf_kappa, binary=True, min_pallas_elements=0)
    jax.block_until_ready(yb)
    yb_ref = _exp_layer_jnp(x, vmf_kappa, binary=True)
    assert jnp.allclose(yb, yb_ref, atol=1e-5, rtol=1e-5), "mismatch (binary=True)"

    # Default heuristic: this tensor is tiny, so the wrapper short-circuits to
    # plain jnp — results must agree with the Pallas path.
    y_small = exp_layer_pallas(x, vmf_kappa, binary=False)
    assert jnp.allclose(y_small, y_ref, atol=1e-5, rtol=1e-5), "mismatch (fallback)"

    # --- multi-block path: ragged last row block + bf16 kept through HBM -----
    xb = jax.random.normal(k2, (2, 4, 40, 96), dtype=jnp.bfloat16)  # rows=30, 2 blocks
    yb16 = exp_layer_pallas(xb, vmf_kappa, binary=True, min_pallas_elements=0)
    jax.block_until_ready(yb16)
    yb16_ref = _exp_layer_jnp(xb, vmf_kappa, binary=True)
    assert yb16.dtype == jnp.bfloat16
    assert jnp.allclose(yb16.astype(jnp.float32), yb16_ref.astype(jnp.float32),
                        atol=1e-2, rtol=1e-2), "mismatch (bf16, ragged blocks)"

    print("KERNEL_OK")
</pallas_src>

<mosaic_0001>
module attributes {stable_mosaic.version = 11 : i64} {
  func.func @exp_kernel(%arg0: i32, %arg1: memref<1xf32, #tpu.memory_space<smem>>, %arg2: memref<2x1024xf32, #tpu.memory_space<vmem>>, %arg3: memref<2x1024xf32, #tpu.memory_space<vmem>>) attributes {dimension_semantics = [#tpu.dimension_semantics<parallel>], iteration_bounds = array<i64: 1>, scalar_prefetch = 0 : i64, scratch_operands = 0 : i64, tpu.core_type = #tpu.core_type<tc>, window_params = [{transform_indices = @transform_0, window_bounds = array<i64: 1>}, {transform_indices = @transform_1, window_bounds = array<i64: 2, 1024>}, {transform_indices = @transform_2, window_bounds = array<i64: 2, 1024>}]} {
    %c0 = arith.constant 0 : index
    %0 = memref.load %arg1[%c0] : memref<1xf32, #tpu.memory_space<smem>>
    %c0_0 = arith.constant 0 : index
    %c0_1 = arith.constant 0 : index
    %1 = vector.load %arg2[%c0_0, %c0_1] : memref<2x1024xf32, #tpu.memory_space<vmem>>, vector<2x1024xf32>
    %2 = vector.broadcast %0 : f32 to vector<2x1024xf32>
    %3 = arith.mulf %2, %1 : vector<2x1024xf32>
    %4 = math.exp %3 : vector<2x1024xf32>
    %c0_2 = arith.constant 0 : index
    %c0_3 = arith.constant 0 : index
    %5 = vector.load %arg3[%c0_2, %c0_3] : memref<2x1024xf32, #tpu.memory_space<vmem>>, vector<2x1024xf32>
    tpu.vector_store %arg3[%c0_2, %c0_3], %4 {strides = array<i32>} : memref<2x1024xf32, #tpu.memory_space<vmem>>, vector<2x1024xf32>,
    return
  }
  func.func @transform_0(%arg0: i32) -> i32 {
    %c0_i32 = arith.constant 0 : i32
    %c0_i32_0 = arith.constant 0 : i32
    return %c0_i32 : i32
  }
  func.func @transform_1(%arg0: i32) -> (i32, i32) {
    %c0_i32 = arith.constant 0 : i32
    %c0_i32_0 = arith.constant 0 : i32
    return %arg0, %c0_i32 : i32, i32
  }
  func.func @transform_2(%arg0: i32) -> (i32, i32) {
    %c0_i32 = arith.constant 0 : i32
    %c0_i32_0 = arith.constant 0 : i32
    return %arg0, %c0_i32 : i32, i32
  }
}

</mosaic_0001>

<bundles_post_ra>
// kernel: tpu_custom_call.1
= control target key start
LH: loop header
LB: loop body
LE: loop exit
PB: predicated region body
PF: predicated region fallthrough
CT: control target
= control target key end

     0   :  { %8 = vsyncpa [#allocation4], 0  ;;  %s140_s0 = inlined_call_operand.<no memory space> [shape: f32[1], index: 0, kind: input, shape index: {}]   ;;  %s141_s1 = inlined_call_operand.hbm [shape: f32[2,1024], index: 1, kind: input, shape index: {}]   ;;  %s142_s2 = inlined_call_operand.hbm [shape: f32[2,1024], index: 2, kind: output, shape index: {}]  }
   0x1   :  { %9 = vsyncpa [#allocation5], 0  ;;  %s17_s11 = sshll.u32 %s141_s1, 4  ;;  %s114_s12 = smov [#allocation3]   ;;  %s18_s11 = int_to_ptr.hbm [resolvable:$true] %s17_s11 }
   0x2   :  { %s19_s13 = sshll.u32 %s114_s12, 4  ;;  %s20_s13 = int_to_ptr.vmem [resolvable:$true] %s19_s13 }
   0x3   :  { %22 = dma.hbm_to_vmem [thread:$0]  %s18_s11, 256, %s20_s13, [#allocation4]  }
   0x4   :  { %110 = dma.done.wait [#allocation4], 256  }
   0x5   :  { %111 = vsyncadd [#allocation4], 4294967040  ;;  %v30_v0 = vstv %s140_s0  ;;  %v28_v1 = vld [vmem:[#allocation3] sm:$0xff]  ;;  %v29_v2 = vld [vmem:[#allocation3 + $0x8] sm:$0xff]  ;;  %s115_s1 = smov [#allocation6]   ;;  %s46_s19 = sshll.u32 %s142_s2, 4  ;;  %s47_s19 = int_to_ptr.hbm [resolvable:$true] %s46_s19 }
   0x6   :  { %v31_v3 = vmul.f32 %v30_v0, %v28_v1  ;;  %v32_v4 = vmul.f32 %v30_v0, %v29_v2  ;;  %s44_s16 = sshll.u32 %s115_s1, 4  ;;  %s45_s16 = int_to_ptr.vmem [resolvable:$true] %s44_s16 }
   0x8   :  { %v33_v5 = vmul.f32 1.442695, %v31_v3  ;;  %v35_v6 = vmul.f32 1.442695, %v32_v4 }
   0xa   :  { %58 = vpow2.f32 %v33_v5 }
   0xb   :  { %60 = vpow2.f32 %v35_v6 }
  0x10   :  { %v59_v7 = vpop.eup %58 }
  0x11   :  { %v61_v8 = vpop.eup %60  ;;  %37 = vst [vmem:[#allocation6] sm:$0xff] %v59_v7 }
  0x12   :  { %38 = vst [vmem:[#allocation6 + $0x8] sm:$0xff] %v61_v8 }
  0x13   :  { %49 = dma.vmem_to_hbm [thread:$0]  %s45_s16, 256, %s47_s19, [#allocation5]  }
  0x14   :  { %112 = dma.done.wait [#allocation5], 256  }
  0x15   :  { %113 = vsyncadd [#allocation5], 4294967040 }
  0x16   :  { %54 = vsyncpa [#allocation4], 1 }
  0x17   :  { %55 = vsyncpa [#allocation5], 1 }

</bundles_post_ra>
